<compile_context>
chip_gen: v7x
topology: tpu7x:2x2x1
jax: 0.10.0
libtpu: 0.0.40
codegen_flags: <defaults>
</compile_context>

<pallas_src>
import jax
import jax.numpy as jnp
from jax import lax
from jax.experimental import pallas as pl
from jax.experimental.pallas import tpu as pltpu


# ----------------------------- Pallas kernel -------------------------------

def _fused_feature_head_kernel(patches_ref, w_conv_ref, b_conv_ref,
                               w_head_ref, b_head_ref,
                               feat_ref, logits_ref, conv_scr):
    """Fused conv(im2col matmul)+bias+ReLU and linear head for one batch block.

    patches_ref : (KKC, B*HW)    bf16  im2col patches, channel-major flat layout
    w_conv_ref  : (Cout, KKC)    bf16  conv weight
    b_conv_ref  : (Cout, 1)      f32   conv bias
    w_head_ref  : (F=Cout*HW,Cp) bf16  head weight (classes zero-padded to Cp lanes)
    b_head_ref  : (1, Cp)        f32   head bias   (zero-padded)
    feat_ref    : (B, Cout, HW)  f32   relu(conv), NCHW order per image
    logits_ref  : (B, Cp)        f32   padded logits (lane-dense)
    conv_scr    : (Cout, B*HW)   f32   VMEM scratch holding the raw conv block
    """
    B, Cout, HW = feat_ref.shape
    Cp = logits_ref.shape[-1]

    # --- conv: ONE lane-dense MXU matmul over the whole batch block, f32 acc.
    conv = jnp.dot(w_conv_ref[...], patches_ref[...],
                   preferred_element_type=jnp.float32)          # (Cout, B*HW)
    conv = jnp.maximum(conv + b_conv_ref[...], 0.0)             # bias + ReLU in f32
    conv_scr[...] = conv

    # --- re-home per-image slabs (Cout, HW) into the (B, Cout, HW) output block.
    # Each slab is 2 aligned vregs (8 sublanes x 256 lanes); the loop is pure
    # ld/st-slot work (lane offsets are multiples of HW=256, i.e. tile-aligned).
    def scatter(b, carry):
        start = pl.multiple_of(b * HW, HW)
        feat_ref[b] = conv_scr[:, pl.ds(start, HW)]
        return carry
    lax.fori_loop(0, B, scatter, 0)

    # --- head with M = B rows:
    #   logits[b, c] = b_lin[c] + sum_o feat[b, o, :] @ w_head[o*HW:(o+1)*HW, c]
    # Each of the 8 dots is [B, HW] @ [HW, Cp] (fills MXU rows when B=128..256);
    # the LHS is a sublane-strided read of the just-written feature block.
    acc = jnp.zeros((B, Cp), jnp.float32)
    for o in range(Cout):                                        # Cout = 8, unrolled
        lhs = feat_ref[:, o, :].astype(jnp.bfloat16)             # (B, HW)
        acc = acc + jnp.dot(lhs, w_head_ref[o * HW:(o + 1) * HW, :],
                            preferred_element_type=jnp.float32)
    logits_ref[...] = acc + b_head_ref[...]


# ------------------------------ JAX wrapper ---------------------------------

def feature_model_forward(x, params, *, batch_block=256, classes_pad=128):
    """Pallas implementation of FeatureModel.forward (non-equivariant path).

    x: [N, Cin, H, W] float32 (NCHW, like PyTorch)
    returns (features_flat [N, Cout*H*W], output [N, num_classes])

    Numerical contract: both matmuls run with bf16 operands and f32 accumulation
    (features/logits deviate from a pure-f32 reference at the ~1e-2 level).
    """
    w_conv = params["w_conv"]   # [Cout, Cin, K, K]
    b_conv = params["b_conv"]   # [Cout]
    w_lin = params["w_lin"]     # [num_classes, Cout*H*W]  (torch Linear layout)
    b_lin = params["b_lin"]     # [num_classes]

    N, Cin, H, W = x.shape
    Cout, _, K, _ = w_conv.shape
    num_classes = w_lin.shape[0]
    HW = H * W
    KKC = K * K * Cin
    F = Cout * HW
    pad = K // 2
    Cp = classes_pad
    assert Cp % 128 == 0 and num_classes <= Cp, \
        "classes_pad must be a multiple of 128 and >= num_classes"
    assert w_lin.shape[1] == F

    # --- batch blocking: B images per grid step (256 fills v6e/v7x MXU rows;
    #     use 128 on v5e).  Keep >=2 grid steps at large N so both v7x TCs work.
    B = min(batch_block, N)
    n_blocks = pl.cdiv(N, B)
    Npad = n_blocks * B
    if Npad != N:
        x = jnp.pad(x, ((0, Npad - N), (0, 0), (0, 0), (0, 0)))

    # --- wrapper-side im2col in channel-major flat layout [KKC, Npad*HW]
    #     rows = (kh, kw, cin), columns = (image, spatial) so each grid step's
    #     block [KKC, B*HW] feeds one lane-dense conv matmul.
    xp = jnp.pad(x, ((0, 0), (0, 0), (pad, pad), (pad, pad)))
    cols = []
    for kh in range(K):
        for kw in range(K):
            sl = xp[:, :, kh:kh + H, kw:kw + W].reshape(Npad, Cin, HW)
            cols.append(sl.transpose(1, 0, 2).reshape(Cin, Npad * HW))
    patches = jnp.concatenate(cols, axis=0).astype(jnp.bfloat16)      # [KKC, Npad*HW]

    # Conv weight matching the (kh, kw, cin) row ordering above.
    w_conv_mat = (w_conv.transpose(0, 2, 3, 1)
                  .reshape(Cout, KKC).astype(jnp.bfloat16))            # [Cout, KKC]
    b_conv2 = b_conv.reshape(Cout, 1).astype(jnp.float32)              # [Cout, 1]

    # Head weight as [F, Cp] = w_lin.T zero-padded to 128 lanes of classes.
    w_head = jnp.zeros((F, Cp), jnp.bfloat16)
    w_head = w_head.at[:, :num_classes].set(w_lin.T.astype(jnp.bfloat16))
    b_head = jnp.zeros((1, Cp), jnp.float32)
    b_head = b_head.at[0, :num_classes].set(b_lin.astype(jnp.float32))

    # Grid-invariant operands: single VMEM buffer, DMA'd once.
    const = dict(pipeline_mode=pl.Buffered(1))

    feat3, logits2 = pl.pallas_call(
        _fused_feature_head_kernel,
        out_shape=(jax.ShapeDtypeStruct((Npad, Cout, HW), jnp.float32),
                   jax.ShapeDtypeStruct((Npad, Cp), jnp.float32)),
        grid=(n_blocks,),
        in_specs=[
            pl.BlockSpec((KKC, B * HW), lambda i: (0, i)),             # per-block patches
            pl.BlockSpec((Cout, KKC), lambda i: (0, 0), **const),      # conv weight
            pl.BlockSpec((Cout, 1), lambda i: (0, 0), **const),        # conv bias
            pl.BlockSpec((F, Cp), lambda i: (0, 0), **const),          # head weight
            pl.BlockSpec((1, Cp), lambda i: (0, 0), **const),          # head bias
        ],
        out_specs=(
            pl.BlockSpec((B, Cout, HW), lambda i: (i, 0, 0)),          # features
            pl.BlockSpec((B, Cp), lambda i: (i, 0)),                   # padded logits
        ),
        scratch_shapes=[pltpu.VMEM((Cout, B * HW), jnp.float32)],
        compiler_params=pltpu.CompilerParams(
            dimension_semantics=("parallel",)),
        # NOTE: per-step VMEM at B=256 is ~16 MiB (fits the 32 MiB default
        # scoped limit); raise vmem_limit_bytes only if B is pushed past ~256.
    )(patches, w_conv_mat, b_conv2, w_head, b_head)

    # feat3[n, c, h*W+w] == relu(conv)[n, c, h, w]  => plain (free, row-major)
    # reshape gives the exact torch NCHW flatten ordering.
    features_flat = feat3[:N].reshape(N, F)                     # [N, Cout*H*W]
    output = logits2[:N, :num_classes]                          # [N, num_classes]
    return features_flat, output


# ------------------------------ main ----------------------------------------

if __name__ == "__main__":
    key = jax.random.PRNGKey(0)
    k_x, k_wc, k_bc, k_wl, k_bl = jax.random.split(key, 5)

    # Small correctness harness (N=2).  For performance measurement use a
    # realistic batch (N >= 512 so B=256 gives >=2 parallel grid steps) and an
    # xprof trace with min-of-runs; N=2 is launch-overhead dominated.
    N, Cin, H, W = 2, 4, 16, 16
    Cout, K = 8, 3
    num_classes = 10
    feat_dim = Cout * H * W

    x = jax.random.normal(k_x, (N, Cin, H, W), dtype=jnp.float32)

    params = {
        "w_conv": 0.1 * jax.random.normal(k_wc, (Cout, Cin, K, K), jnp.float32),
        "b_conv": 0.1 * jax.random.normal(k_bc, (Cout,), jnp.float32),
        "w_lin": 0.05 * jax.random.normal(k_wl, (num_classes, feat_dim), jnp.float32),
        "b_lin": 0.05 * jax.random.normal(k_bl, (num_classes,), jnp.float32),
    }

    fwd = jax.jit(feature_model_forward)
    features, output = fwd(x, params)
    jax.block_until_ready((features, output))

    assert features.shape == (N, feat_dim)
    assert output.shape == (N, num_classes)

    # sanity check against a plain-JAX f32 reference; tolerances account for the
    # bf16 matmul operands (f32 accumulation) used on the MXU.
    def ref(x, p):
        conv = lax.conv_general_dilated(
            x, p["w_conv"], window_strides=(1, 1), padding="SAME",
            dimension_numbers=("NCHW", "OIHW", "NCHW"))
        conv = jnp.maximum(conv + p["b_conv"][None, :, None, None], 0.0)
        f = conv.reshape(conv.shape[0], -1)
        return f, f @ p["w_lin"].T + p["b_lin"]

    f_ref, o_ref = ref(x, params)
    assert jnp.allclose(features, f_ref, atol=5e-2, rtol=5e-2), \
        float(jnp.max(jnp.abs(features - f_ref)))
    assert jnp.allclose(output, o_ref, atol=1e-1, rtol=5e-2), \
        float(jnp.max(jnp.abs(output - o_ref)))

    print("KERNEL_OK")
</pallas_src>

<mosaic_0001>
module attributes {stable_mosaic.version = 11 : i64} {
  func.func @_fused_feature_head_kernel(%arg0: i32, %arg1: memref<36x512xbf16, #tpu.memory_space<vmem>>, %arg2: memref<8x36xbf16, #tpu.memory_space<vmem>>, %arg3: memref<8x1xf32, #tpu.memory_space<vmem>>, %arg4: memref<2048x128xbf16, #tpu.memory_space<vmem>>, %arg5: memref<1x128xf32, #tpu.memory_space<vmem>>, %arg6: memref<2x8x256xf32, #tpu.memory_space<vmem>>, %arg7: memref<2x128xf32, #tpu.memory_space<vmem>>, %arg8: memref<8x512xf32, #tpu.memory_space<vmem>>) attributes {dimension_semantics = [#tpu.dimension_semantics<parallel>], iteration_bounds = array<i64: 1>, scalar_prefetch = 0 : i64, scratch_operands = 1 : i64, tpu.core_type = #tpu.core_type<tc>, window_params = [{transform_indices = @transform_0, window_bounds = array<i64: 36, 512>}, {pipeline_mode = #tpu.pipeline_mode<synchronous>, transform_indices = @transform_1, window_bounds = array<i64: 8, 36>}, {pipeline_mode = #tpu.pipeline_mode<synchronous>, transform_indices = @transform_2, window_bounds = array<i64: 8, 1>}, {pipeline_mode = #tpu.pipeline_mode<synchronous>, transform_indices = @transform_3, window_bounds = array<i64: 2048, 128>}, {pipeline_mode = #tpu.pipeline_mode<synchronous>, transform_indices = @transform_4, window_bounds = array<i64: 1, 128>}, {transform_indices = @transform_5, window_bounds = array<i64: 2, 8, 256>}, {transform_indices = @transform_6, window_bounds = array<i64: 2, 128>}]} {
    %c0 = arith.constant 0 : index
    %c0_0 = arith.constant 0 : index
    %0 = vector.load %arg2[%c0, %c0_0] : memref<8x36xbf16, #tpu.memory_space<vmem>>, vector<8x36xbf16>
    %c0_1 = arith.constant 0 : index
    %c0_2 = arith.constant 0 : index
    %1 = vector.load %arg1[%c0_1, %c0_2] : memref<36x512xbf16, #tpu.memory_space<vmem>>, vector<36x512xbf16>
    %cst = arith.constant dense<0.000000e+00> : vector<8x512xf32>
    %2 = tpu.matmul %0, %1, %cst {dimension_numbers = #tpu.dot_dimension_numbers<[1], [0], [0], [1], [0, 0, 1, 1], [], []>} : vector<8x36xbf16>, vector<36x512xbf16>, vector<8x512xf32> -> vector<8x512xf32>
    %c0_3 = arith.constant 0 : index
    %c0_4 = arith.constant 0 : index
    %3 = vector.load %arg3[%c0_3, %c0_4] : memref<8x1xf32, #tpu.memory_space<vmem>>, vector<8x1xf32>
    %4 = vector.broadcast %3 : vector<8x1xf32> to vector<8x512xf32>
    %5 = arith.addf %2, %4 : vector<8x512xf32>
    %cst_5 = arith.constant 0.000000e+00 : f32
    %6 = vector.broadcast %cst_5 : f32 to vector<8x512xf32>
    %7 = arith.maximumf %5, %6 : vector<8x512xf32>
    %c0_6 = arith.constant 0 : index
    %c0_7 = arith.constant 0 : index
    %8 = vector.load %arg8[%c0_6, %c0_7] : memref<8x512xf32, #tpu.memory_space<vmem>>, vector<8x512xf32>
    tpu.vector_store %arg8[%c0_6, %c0_7], %7 {strides = array<i32>} : memref<8x512xf32, #tpu.memory_space<vmem>>, vector<8x512xf32>,
    %c0_i32 = arith.constant 0 : i32
    %c2_i32 = arith.constant 2 : i32
    %9 = arith.addi %c0_i32, %c2_i32 : i32
    %c1_i32 = arith.constant 1 : i32
    scf.for %arg9 = %c0_i32 to %9 step %c1_i32  : i32 {
      %c256_i32 = arith.constant 256 : i32
      %63 = arith.muli %arg9, %c256_i32 : i32
      %64 = tpu.assume_multiple %63, 256 : i32
      %c0_48 = arith.constant 0 : index
      %65 = arith.index_cast %64 : i32 to index
      %66 = vector.load %arg8[%c0_48, %65] : memref<8x512xf32, #tpu.memory_space<vmem>>, vector<8x256xf32>
      %67 = arith.index_cast %arg9 : i32 to index
      %c0_49 = arith.constant 0 : index
      %c0_50 = arith.constant 0 : index
      %68 = vector.load %arg6[%67, %c0_49, %c0_50] : memref<2x8x256xf32, #tpu.memory_space<vmem>>, vector<1x8x256xf32>
      %69 = vector.shape_cast %68 : vector<1x8x256xf32> to vector<8x256xf32>
      %70 = vector.shape_cast %66 : vector<8x256xf32> to vector<1x8x256xf32>
      tpu.vector_store %arg6[%67, %c0_49, %c0_50], %70 {strides = array<i32>} : memref<2x8x256xf32, #tpu.memory_space<vmem>>, vector<1x8x256xf32>,
    }
    %c2_i32_8 = arith.constant 2 : i32
    %cst_9 = arith.constant 0.000000e+00 : f32
    %10 = vector.broadcast %cst_9 : f32 to vector<2x128xf32>
    %c0_10 = arith.constant 0 : index
    %c0_11 = arith.constant 0 : index
    %c0_12 = arith.constant 0 : index
    %11 = vector.load %arg6[%c0_10, %c0_11, %c0_12] : memref<2x8x256xf32, #tpu.memory_space<vmem>>, vector<2x1x256xf32>
    %12 = vector.shape_cast %11 : vector<2x1x256xf32> to vector<2x256xf32>
    %13 = arith.truncf %12 : vector<2x256xf32> to vector<2x256xbf16>
    %c0_13 = arith.constant 0 : index
    %c0_14 = arith.constant 0 : index
    %14 = vector.load %arg4[%c0_13, %c0_14] : memref<2048x128xbf16, #tpu.memory_space<vmem>>, vector<256x128xbf16>
    %cst_15 = arith.constant dense<0.000000e+00> : vector<2x128xf32>
    %15 = tpu.matmul %13, %14, %cst_15 {dimension_numbers = #tpu.dot_dimension_numbers<[1], [0], [0], [1], [0, 0, 1, 1], [], []>} : vector<2x256xbf16>, vector<256x128xbf16>, vector<2x128xf32> -> vector<2x128xf32>
    %16 = arith.addf %10, %15 : vector<2x128xf32>
    %c0_16 = arith.constant 0 : index
    %c1 = arith.constant 1 : index
    %c0_17 = arith.constant 0 : index
    %17 = vector.load %arg6[%c0_16, %c1, %c0_17] : memref<2x8x256xf32, #tpu.memory_space<vmem>>, vector<2x1x256xf32>
    %18 = vector.shape_cast %17 : vector<2x1x256xf32> to vector<2x256xf32>
    %19 = arith.truncf %18 : vector<2x256xf32> to vector<2x256xbf16>
    %c256 = arith.constant 256 : index
    %c0_18 = arith.constant 0 : index
    %20 = vector.load %arg4[%c256, %c0_18] : memref<2048x128xbf16, #tpu.memory_space<vmem>>, vector<256x128xbf16>
    %cst_19 = arith.constant dense<0.000000e+00> : vector<2x128xf32>
    %21 = tpu.matmul %19, %20, %cst_19 {dimension_numbers = #tpu.dot_dimension_numbers<[1], [0], [0], [1], [0, 0, 1, 1], [], []>} : vector<2x256xbf16>, vector<256x128xbf16>, vector<2x128xf32> -> vector<2x128xf32>
    %22 = arith.addf %16, %21 : vector<2x128xf32>
    %c0_20 = arith.constant 0 : index
    %c2 = arith.constant 2 : index
    %c0_21 = arith.constant 0 : index
    %23 = vector.load %arg6[%c0_20, %c2, %c0_21] : memref<2x8x256xf32, #tpu.memory_space<vmem>>, vector<2x1x256xf32>
    %24 = vector.shape_cast %23 : vector<2x1x256xf32> to vector<2x256xf32>
    %25 = arith.truncf %24 : vector<2x256xf32> to vector<2x256xbf16>
    %c512 = arith.constant 512 : index
    %c0_22 = arith.constant 0 : index
    %26 = vector.load %arg4[%c512, %c0_22] : memref<2048x128xbf16, #tpu.memory_space<vmem>>, vector<256x128xbf16>
    %cst_23 = arith.constant dense<0.000000e+00> : vector<2x128xf32>
    %27 = tpu.matmul %25, %26, %cst_23 {dimension_numbers = #tpu.dot_dimension_numbers<[1], [0], [0], [1], [0, 0, 1, 1], [], []>} : vector<2x256xbf16>, vector<256x128xbf16>, vector<2x128xf32> -> vector<2x128xf32>
    %28 = arith.addf %22, %27 : vector<2x128xf32>
    %c0_24 = arith.constant 0 : index
    %c3 = arith.constant 3 : index
    %c0_25 = arith.constant 0 : index
    %29 = vector.load %arg6[%c0_24, %c3, %c0_25] : memref<2x8x256xf32, #tpu.memory_space<vmem>>, vector<2x1x256xf32>
    %30 = vector.shape_cast %29 : vector<2x1x256xf32> to vector<2x256xf32>
    %31 = arith.truncf %30 : vector<2x256xf32> to vector<2x256xbf16>
    %c768 = arith.constant 768 : index
    %c0_26 = arith.constant 0 : index
    %32 = vector.load %arg4[%c768, %c0_26] : memref<2048x128xbf16, #tpu.memory_space<vmem>>, vector<256x128xbf16>
    %cst_27 = arith.constant dense<0.000000e+00> : vector<2x128xf32>
    %33 = tpu.matmul %31, %32, %cst_27 {dimension_numbers = #tpu.dot_dimension_numbers<[1], [0], [0], [1], [0, 0, 1, 1], [], []>} : vector<2x256xbf16>, vector<256x128xbf16>, vector<2x128xf32> -> vector<2x128xf32>
    %34 = arith.addf %28, %33 : vector<2x128xf32>
    %c0_28 = arith.constant 0 : index
    %c4 = arith.constant 4 : index
    %c0_29 = arith.constant 0 : index
    %35 = vector.load %arg6[%c0_28, %c4, %c0_29] : memref<2x8x256xf32, #tpu.memory_space<vmem>>, vector<2x1x256xf32>
    %36 = vector.shape_cast %35 : vector<2x1x256xf32> to vector<2x256xf32>
    %37 = arith.truncf %36 : vector<2x256xf32> to vector<2x256xbf16>
    %c1024 = arith.constant 1024 : index
    %c0_30 = arith.constant 0 : index
    %38 = vector.load %arg4[%c1024, %c0_30] : memref<2048x128xbf16, #tpu.memory_space<vmem>>, vector<256x128xbf16>
    %cst_31 = arith.constant dense<0.000000e+00> : vector<2x128xf32>
    %39 = tpu.matmul %37, %38, %cst_31 {dimension_numbers = #tpu.dot_dimension_numbers<[1], [0], [0], [1], [0, 0, 1, 1], [], []>} : vector<2x256xbf16>, vector<256x128xbf16>, vector<2x128xf32> -> vector<2x128xf32>
    %40 = arith.addf %34, %39 : vector<2x128xf32>
    %c0_32 = arith.constant 0 : index
    %c5 = arith.constant 5 : index
    %c0_33 = arith.constant 0 : index
    %41 = vector.load %arg6[%c0_32, %c5, %c0_33] : memref<2x8x256xf32, #tpu.memory_space<vmem>>, vector<2x1x256xf32>
    %42 = vector.shape_cast %41 : vector<2x1x256xf32> to vector<2x256xf32>
    %43 = arith.truncf %42 : vector<2x256xf32> to vector<2x256xbf16>
    %c1280 = arith.constant 1280 : index
    %c0_34 = arith.constant 0 : index
    %44 = vector.load %arg4[%c1280, %c0_34] : memref<2048x128xbf16, #tpu.memory_space<vmem>>, vector<256x128xbf16>
    %cst_35 = arith.constant dense<0.000000e+00> : vector<2x128xf32>
    %45 = tpu.matmul %43, %44, %cst_35 {dimension_numbers = #tpu.dot_dimension_numbers<[1], [0], [0], [1], [0, 0, 1, 1], [], []>} : vector<2x256xbf16>, vector<256x128xbf16>, vector<2x128xf32> -> vector<2x128xf32>
    %46 = arith.addf %40, %45 : vector<2x128xf32>
    %c0_36 = arith.constant 0 : index
    %c6 = arith.constant 6 : index
    %c0_37 = arith.constant 0 : index
    %47 = vector.load %arg6[%c0_36, %c6, %c0_37] : memref<2x8x256xf32, #tpu.memory_space<vmem>>, vector<2x1x256xf32>
    %48 = vector.shape_cast %47 : vector<2x1x256xf32> to vector<2x256xf32>
    %49 = arith.truncf %48 : vector<2x256xf32> to vector<2x256xbf16>
    %c1536 = arith.constant 1536 : index
    %c0_38 = arith.constant 0 : index
    %50 = vector.load %arg4[%c1536, %c0_38] : memref<2048x128xbf16, #tpu.memory_space<vmem>>, vector<256x128xbf16>
    %cst_39 = arith.constant dense<0.000000e+00> : vector<2x128xf32>
    %51 = tpu.matmul %49, %50, %cst_39 {dimension_numbers = #tpu.dot_dimension_numbers<[1], [0], [0], [1], [0, 0, 1, 1], [], []>} : vector<2x256xbf16>, vector<256x128xbf16>, vector<2x128xf32> -> vector<2x128xf32>
    %52 = arith.addf %46, %51 : vector<2x128xf32>
    %c0_40 = arith.constant 0 : index
    %c7 = arith.constant 7 : index
    %c0_41 = arith.constant 0 : index
    %53 = vector.load %arg6[%c0_40, %c7, %c0_41] : memref<2x8x256xf32, #tpu.memory_space<vmem>>, vector<2x1x256xf32>
    %54 = vector.shape_cast %53 : vector<2x1x256xf32> to vector<2x256xf32>
    %55 = arith.truncf %54 : vector<2x256xf32> to vector<2x256xbf16>
    %c1792 = arith.constant 1792 : index
    %c0_42 = arith.constant 0 : index
    %56 = vector.load %arg4[%c1792, %c0_42] : memref<2048x128xbf16, #tpu.memory_space<vmem>>, vector<256x128xbf16>
    %cst_43 = arith.constant dense<0.000000e+00> : vector<2x128xf32>
    %57 = tpu.matmul %55, %56, %cst_43 {dimension_numbers = #tpu.dot_dimension_numbers<[1], [0], [0], [1], [0, 0, 1, 1], [], []>} : vector<2x256xbf16>, vector<256x128xbf16>, vector<2x128xf32> -> vector<2x128xf32>
    %58 = arith.addf %52, %57 : vector<2x128xf32>
    %c0_44 = arith.constant 0 : index
    %c0_45 = arith.constant 0 : index
    %59 = vector.load %arg5[%c0_44, %c0_45] : memref<1x128xf32, #tpu.memory_space<vmem>>, vector<1x128xf32>
    %60 = vector.broadcast %59 : vector<1x128xf32> to vector<2x128xf32>
    %61 = arith.addf %58, %60 : vector<2x128xf32>
    %c0_46 = arith.constant 0 : index
    %c0_47 = arith.constant 0 : index
    %62 = vector.load %arg7[%c0_46, %c0_47] : memref<2x128xf32, #tpu.memory_space<vmem>>, vector<2x128xf32>
    tpu.vector_store %arg7[%c0_46, %c0_47], %61 {strides = array<i32>} : memref<2x128xf32, #tpu.memory_space<vmem>>, vector<2x128xf32>,
    return
  }
  func.func @transform_0(%arg0: i32) -> (i32, i32) {
    %c0_i32 = arith.constant 0 : i32
    %c0_i32_0 = arith.constant 0 : i32
    return %c0_i32, %arg0 : i32, i32
  }
  func.func @transform_1(%arg0: i32) -> (i32, i32) {
    %c0_i32 = arith.constant 0 : i32
    %c0_i32_0 = arith.constant 0 : i32
    %c0_i32_1 = arith.constant 0 : i32
    return %c0_i32, %c0_i32_0 : i32, i32
  }
  func.func @transform_2(%arg0: i32) -> (i32, i32) {
    %c0_i32 = arith.constant 0 : i32
    %c0_i32_0 = arith.constant 0 : i32
    %c0_i32_1 = arith.constant 0 : i32
    return %c0_i32, %c0_i32_0 : i32, i32
  }
  func.func @transform_3(%arg0: i32) -> (i32, i32) {
    %c0_i32 = arith.constant 0 : i32
    %c0_i32_0 = arith.constant 0 : i32
    %c0_i32_1 = arith.constant 0 : i32
    return %c0_i32, %c0_i32_0 : i32, i32
  }
  func.func @transform_4(%arg0: i32) -> (i32, i32) {
    %c0_i32 = arith.constant 0 : i32
    %c0_i32_0 = arith.constant 0 : i32
    %c0_i32_1 = arith.constant 0 : i32
    return %c0_i32, %c0_i32_0 : i32, i32
  }
  func.func @transform_5(%arg0: i32) -> (i32, i32, i32) {
    %c0_i32 = arith.constant 0 : i32
    %c0_i32_0 = arith.constant 0 : i32
    %c0_i32_1 = arith.constant 0 : i32
    return %arg0, %c0_i32, %c0_i32_0 : i32, i32, i32
  }
  func.func @transform_6(%arg0: i32) -> (i32, i32) {
    %c0_i32 = arith.constant 0 : i32
    %c0_i32_0 = arith.constant 0 : i32
    return %arg0, %c0_i32 : i32, i32
  }
}

</mosaic_0001>

<bundles_post_ra>
// kernel: feature_model_forward.1
= control target key start
LH: loop header
LB: loop body
LE: loop exit
PB: predicated region body
PF: predicated region fallthrough
CT: control target
= control target key end

     0   :  { %12 = vsyncpa [#allocation4], 0  ;;  %v2498_v1 = vmov 0   ;;  %vm95_vm0 = vcmask 1041408   ;;  %vm91_vm1 = vcmask 293888   ;;  %s3073_s0 = inlined_call_operand.vmem [shape: bf16[36,512], index: 0, kind: input, shape index: {}]   ;;  %s3074_s1 = inlined_call_operand.vmem [shape: bf16[8,36], index: 1, kind: input, shape index: {}]   ;;  %s3075_s2 = inlined_call_operand.vmem [shape: f32[8,1], index: 2, kind: input, shape index: {}]   ;;  %s3076_s3 = inlined_call_operand.vmem [shape: bf16[2048,128], index: 3, kind: input, shape index: {}]   ;;  %s3077_s4 = inlined_call_operand.vmem [shape: f32[1,128], index: 4, kind: input, shape index: {}]   ;;  %s3078_s5 = inlined_call_operand.vmem [shape: f32[2,8,256], index: 5, kind: output, shape index: {0}]   ;;  %s3079_s6 = inlined_call_operand.hbm [shape: f32[2,128], index: 6, kind: output, shape index: {1}]  }
   0x1   :  { %v2322_v0 = vld [vmem:[%s3073_s0 + $0x4] ss:$16 sps:$4 sm:$0xff]   ;;  %140 = vmatprep.mubr.bf16.mxu0 %v2498_v1  ;;  %181 = vmatprep.mubr.bf16.mxu1 %v2498_v1  ;;  %v2324_v2 = vld [vmem:[%s3073_s0 + $0xc] ss:$16 sps:$4 sm:$0xff]   ;;  %v2326_v3 = vld [vmem:[%s3073_s0] ss:$16 sps:$4 sm:$0xff]  }
   0x2   :  { %v2327_v4 = vld [vmem:[%s3073_s0 + $0x8] ss:$16 sps:$4 sm:$0xff]   ;;  %2321 = vset.pattern.permute.xlu0 %v2498_v1  ;;  %108 = vmatprep.subr.bf16.mxu0 %v2322_v0  ;;  %v2328_v5 = vld [vmem:[%s3073_s0 + $0x24] ss:$16 sps:$4 sm:$0xff]   ;;  %v2330_v6 = vld [vmem:[%s3073_s0 + $0x2c] ss:$16 sps:$4 sm:$0xff]  }
   0x3   :  { %149 = vmatprep.subr.bf16.mxu1 %v2324_v2  ;;  %109 = vmatpush1.bf16.msra.mxu0 %v2326_v3  ;;  %v2332_v7 = vld [vmem:[%s3073_s0 + $0x20] ss:$16 sps:$4 sm:$0xff]   ;;  %v2333_v8 = vld [vmem:[%s3073_s0 + $0x28] ss:$16 sps:$4 sm:$0xff]  }
   0x4   :  { %150 = vmatpush1.bf16.msra.mxu1 %v2327_v4  ;;  %110 = vmatprep.subr.bf16.mxu0 %v2328_v5  ;;  %v33_v9 = vld [vmem:[%s3073_s0 + $0x40] sm:$0x33]  ;;  %v34_v11 = vld [vmem:[%s3073_s0 + $0x48] sm:$0x33]  ;;  %s2494_s0 = smov 0  }
   0x5   :  { %151 = vmatprep.subr.bf16.mxu1 %v2330_v6  ;;  %v1979_v10 = vcombine.high %v33_v9, %v33_v9  ;;  %v1978_v12 = vcombine.low %v33_v9, %v33_v9  ;;  %v35_v13 = vld [vmem:[%s3075_s2] sm:$0xff]  ;;  %v1981_v14 = vcombine.high %v34_v11, %v34_v11  ;;  %v1980_v15 = vcombine.low %v34_v11, %v34_v11 }
   0x6   :  { %38 = vperm.xlu0 %2321, %v35_v13   ;;  %v24_v18 = vld [vmem:[%s3074_s1] sm:$0xf] }
   0x7   :  { %111 = vmatpush1.bf16.msra.mxu0 %v2332_v7  ;;  %v97_v16 = vsel %vm95_vm0, %v1978_v12, 0  ;;  %v103_v17 = vsel %vm95_vm0, %v1980_v15, 0 }
   0x8   :  { %152 = vmatpush1.bf16.msra.mxu1 %v2333_v8  ;;  %1982 = vmatprep.subr.msk.bf16.mxu0 %vm95_vm0, %v1979_v10 }
   0x9   :  { %1984 = vmatprep.subr.msk.bf16.mxu1 %vm95_vm0, %v1981_v14 }
   0xb   :  { %113 = vmatpush1.bf16.msra.mxu0 %v97_v16 }
   0xc   :  { %154 = vmatpush1.bf16.msra.mxu1 %v103_v17 }
   0xe   :  { %1983 = vmatmul.mubr.msk.bf16.vlgmr.msra.gmra.mrb[0].mxu0 %vm91_vm1, %v24_v18 }
   0xf   :  { %1985 = vmatmul.mubr.msk.bf16.vlgmr.msra.gmra.mrb[0].mxu1 %vm91_vm1, %v24_v18 }
  0x85   :  { %v39_v19 = vpop.permute.xlu0 %38 }
  0xe1   :  { %v142_v20 = vpop.f32.mrb[0].mxu0 }
  0xe2   :  { %v143_v21 = vadd.f32 %v142_v20, %v39_v19  ;;  %v183_v22 = vpop.f32.mrb[0].mxu1  ;;  %v144_v23 = vpop.f32.mrb[1].mxu0 }
  0xe3   :  { %v184_v24 = vadd.f32 %v183_v22, %v39_v19  ;;  %v145_v25 = vadd.f32 %v144_v23, %v39_v19  ;;  %v185_v26 = vpop.f32.mrb[1].mxu1  ;;  %v146_v27 = vpop.f32.mrb[2].mxu0 }
  0xe4   :  { %v190_v28 = vmax.f32 %v143_v21, 0.0  ;;  %v186_v29 = vadd.f32 %v185_v26, %v39_v19  ;;  %v187_v30 = vpop.f32.mrb[2].mxu1  ;;  %v147_v31 = vpop.f32.mrb[3].mxu0 }
  0xe5   :  { %v192_v32 = vmax.f32 %v184_v24, 0.0  ;;  %v191_v33 = vmax.f32 %v145_v25, 0.0  ;;  %v188_v34 = vpop.f32.mrb[3].mxu1 }
  0xe6   :  { %194 = vst [vmem:[#allocation2] sm:$0xff] %v190_v28  ;;  %v193_v35 = vmax.f32 %v186_v29, 0.0 }
  0xe7   :  { %196 = vst [vmem:[#allocation2 + $0x10] sm:$0xff] %v192_v32  ;;  %195 = vst [vmem:[#allocation2 + $0x8] sm:$0xff] %v191_v33 }
  0xe8   :  { %197 = vst [vmem:[#allocation2 + $0x18] sm:$0xff] %v193_v35 }
  0xe9 LB: > { %s1986_s1 = sshll.u32 %s2496_s0, 8  ;;  %s2134_s2 = sshll.u32 %s2496_s0, 4  ;;  %s2496_s0 = sphi %s2494_s0, %s203_s0  }
  0xea   : > { %s205_s21 = sshra.s32 %s1986_s1, 7  ;;  %s213_s25 = scalar_lea.vmem %s3078_s5, %s2134_s2 }
  0xeb   : > { %s1987_s22 = sshll.u32 %s205_s21, 3  ;;  %s203_s0 = sadd.s32 1, %s2496_s0  }
  0xec   : > { %s208_s26 = scalar_lea.vmem [#allocation2], %s1987_s22  ;;  %p200_p0 = scmp.ge.s32.totalorder %s203_s0, 2  }
  0xed   :  { %v2338_v38 = vld [vmem:[%s3076_s3 + $0xc0] sm:$0xff] (%p200_p0)   ;;  %v2342_v42 = vld [vmem:[%s3076_s3 + $0xc8] sm:$0xff] (%p200_p0)   ;;  %v2346_v46 = vld [vmem:[%s3076_s3 + $0xd0] sm:$0xff] (%p200_p0)   ;;  %v221_v59 = vlaneseq (%p200_p0)  ;;  %vm348_vm2 = vcmask (%p200_p0), 1041409   ;;  %s2499_s0 = smov (%p200_p0), [#allocation3]  }
  0xee   :  { %202 = sbr.rel (!%p200_p0) target bundleno = 233 (0xe9), region = 72  ;;  %v2339_v39 = vld [vmem:[%s3076_s3 + $0x40] sm:$0xff] (%p200_p0)   ;;  %2135 = vmatprep.subr.bf16.mxu0 (%p200_p0), %v2338_v38  ;;  %v2343_v43 = vld [vmem:[%s3076_s3 + $0x48] sm:$0xff] (%p200_p0)   ;;  %v2347_v47 = vld [vmem:[%s3076_s3 + $0x50] sm:$0xff] (%p200_p0)   ;;  %s1951_s1 = sshll.u32 (%p200_p0), %s2499_s0, 4  ;;  %s1952_s1 = int_to_ptr.vmem [resolvable:$true] %s1951_s1 }
  0xef   : > { %v209_v36 = vld [vmem:[%s208_s26] sm:$0xff]  ;;  %v210_v37 = vld [vmem:[%s208_s26 + $0x8] sm:$0xff]  ;;  %2157 = vmatprep.subr.bf16.mxu1 (%p200_p0), %v2339_v39  ;;  %v2348_v48 = vld [vmem:[%s3076_s3 + $0x90] sm:$0xff] (%p200_p0)   ;;  %v222_v0 = vshrl.u32 (%p200_p0), %v221_v59, 7  ;;  %s2466_s2 = scalar_lea.vmem (%p200_p0), %s1952_s1, 32  ;;  %p2471_p2 = scmp.lt.s32.totalorder (%p200_p0), %s1952_s1, %s1952_s1 }
  0xf0   : > { %214 = vst [vmem:[%s213_s25] sm:$0xff] %v209_v36  ;;  %215 = vst [vmem:[%s213_s25 + $0x8] sm:$0xff] %v210_v37  ;;  %v2340_v40 = vld [vmem:[%s3076_s3 + $0x80] sm:$0xff] (%p200_p0)   ;;  %v2344_v44 = vld [vmem:[%s3076_s3 + $0x88] sm:$0xff] (%p200_p0)   ;;  %p2467_p1 = scmp.ne.s32.totalorder (%p200_p0), %s1952_s1, %s2466_s2  ;;  %p2472_p3 = scmp.lt.s32.totalorder (%p200_p0), %s2466_s2, %s2466_s2 }
  0xf1   :  { %v2341_v41 = vld [vmem:[%s3076_s3] sm:$0xff] (%p200_p0)   ;;  %2136 = vmatpush3.bf16.msra.mxu0 (%p200_p0), %v2340_v40  ;;  %v2345_v45 = vld [vmem:[%s3076_s3 + $0x8] sm:$0xff] (%p200_p0)   ;;  %v2349_v49 = vld [vmem:[%s3076_s3 + $0x10] sm:$0xff] (%p200_p0)   ;;  %v2661_v5 = vsub.s32 (%p200_p0), 0, %v222_v0  ;;  %v2666_v7 = vsub.s32 (%p200_p0), 1, %v222_v0 }
  0xf2   :  { %2158 = vmatpush3.bf16.msra.mxu1 (%p200_p0), %v2341_v41  ;;  %2137 = vmatprep.subr.bf16.mxu0 (%p200_p0), %v2342_v42  ;;  %v2350_v50 = vld [vmem:[%s3076_s3 + $0xd8] sm:$0xff] (%p200_p0)   ;;  %v2354_v54 = vld [vmem:[%s3076_s3 + $0xe0] sm:$0xff] (%p200_p0)   ;;  %v2358_v58 = vld [vmem:[%s3076_s3 + $0xe8] sm:$0xff] (%p200_p0)   ;;  %p2473_p4 = por (%p200_p0), %p2472_p3, %p2471_p2 }
  0xf3   :  { %2159 = vmatprep.subr.bf16.mxu1 (%p200_p0), %v2343_v43  ;;  %v2351_v51 = vld [vmem:[%s3076_s3 + $0x58] sm:$0xff] (%p200_p0)   ;;  %v2355_v55 = vld [vmem:[%s3076_s3 + $0x60] sm:$0xff] (%p200_p0)   ;;  %v2359_v60 = vld [vmem:[%s3076_s3 + $0x68] sm:$0xff] (%p200_p0)  }
  0xf4   :  { %v2352_v52 = vld [vmem:[%s3076_s3 + $0x98] sm:$0xff] (%p200_p0)   ;;  %v2356_v56 = vld [vmem:[%s3076_s3 + $0xa0] sm:$0xff] (%p200_p0)   ;;  %v2360_v61 = vld [vmem:[%s3076_s3 + $0xa8] sm:$0xff] (%p200_p0)   ;;  %p2474_p5 = pnand (%p200_p0), %p2473_p4, %p2467_p1 }
  0xf5   :  { %2138 = vmatpush3.bf16.msra.mxu0 %v2344_v44  ;;  %v2353_v53 = vld [vmem:[%s3076_s3 + $0x18] sm:$0xff]   ;;  %v2357_v57 = vld [vmem:[%s3076_s3 + $0x20] sm:$0xff]   ;;  %v2361_v62 = vld [vmem:[%s3076_s3 + $0x28] sm:$0xff]  }
  0xf6   :  { %2160 = vmatpush3.bf16.msra.mxu1 %v2345_v45  ;;  %2139 = vmatprep.subr.bf16.mxu0 %v2346_v46  ;;  %v2362_v63 = vld [vmem:[%s3076_s3 + $0xf0] sm:$0xff]   ;;  %v2366_v4 = vld [vmem:[%s3076_s3 + $0xf8] sm:$0xff]   ;;  %v2370_v22 = vld [vmem:[%s3076_s3 + $0x140] sm:$0xff]  }
  0xf7   :  { %2161 = vmatprep.subr.bf16.mxu1 %v2347_v47  ;;  %v2363_v1 = vld [vmem:[%s3076_s3 + $0x70] sm:$0xff]   ;;  %v2367_v6 = vld [vmem:[%s3076_s3 + $0x78] sm:$0xff]   ;;  %v1991_v10 = vld [vmem:[%s3078_s5 + $0x1] ss:$8 sm:$0x3] }
  0xf8   :  { %v2364_v2 = vld [vmem:[%s3076_s3 + $0xb0] sm:$0xff]   ;;  %v2368_v8 = vld [vmem:[%s3076_s3 + $0xb8] sm:$0xff]   ;;  %v286_v12 = vrot.slane %v1991_v10, %v2661_v5  ;;  %v290_v13 = vrot.slane %v1991_v10, %v2666_v7  ;;  %v216_v16 = vld [vmem:[%s3078_s5] ss:$8 sm:$0x3] }
  0xf9   :  { %2140 = vmatpush3.bf16.msra.mxu0 %v2348_v48  ;;  %v2365_v3 = vld [vmem:[%s3076_s3 + $0x30] sm:$0xff]   ;;  %v2369_v9 = vld [vmem:[%s3076_s3 + $0x38] sm:$0xff]   ;;  %v224_v18 = vrot.slane %v216_v16, %v2661_v5  ;;  %v228_v19 = vrot.slane %v216_v16, %v2666_v7  ;;  %v2371_v27 = vld [vmem:[%s3076_s3 + $0x1c0] sm:$0xff]  }
  0xfa   :  { %2162 = vmatpush3.bf16.msra.mxu1 %v2349_v49  ;;  %2141 = vmatprep.subr.bf16.mxu0 %v2350_v50  ;;  %v1992_v11 = vld [vmem:[%s3078_s5 + $0x11] ss:$8 sm:$0x3]  ;;  %v1990_v17 = vld [vmem:[%s3078_s5 + $0x10] ss:$8 sm:$0x3]  ;;  %v303_v23 = vpack.c.bf16 %v286_v12, %v286_v12  ;;  %v304_v24 = vpack.c.bf16 %v290_v13, %v290_v13 }
  0xfb   :  { %2163 = vmatprep.subr.bf16.mxu1 %v2351_v51  ;;  %v294_v14 = vrot.slane %v1992_v11, %v2661_v5  ;;  %v298_v15 = vrot.slane %v1992_v11, %v2666_v7  ;;  %v232_v20 = vrot.slane %v1990_v17, %v2661_v5  ;;  %v236_v21 = vrot.slane %v1990_v17, %v2666_v7  ;;  %v2372_v44 = vld [vmem:[%s3076_s3 + $0x100] sm:$0xff]   ;;  %v2379_v59 = vld [vmem:[%s3076_s3 + $0x1d0] sm:$0xff]   ;;  %v2384_v0 = vld [vmem:[%s3076_s3 + $0x118] sm:$0xff]  }
  0xfc   :  { %v241_v28 = vpack.c.bf16 %v224_v18, %v224_v18  ;;  %v242_v29 = vpack.c.bf16 %v228_v19, %v228_v19  ;;  %v344_v32 = vunpack.c.l.b16 %v304_v24  ;;  %v343_v34 = vunpack.c.l.b16 %v303_v23  ;;  %v2373_v47 = vld [vmem:[%s3076_s3 + $0x180] sm:$0xff]   ;;  %v2392_v10 = vld [vmem:[%s3076_s3 + $0x128] sm:$0xff]   ;;  %v2394_v12 = vld [vmem:[%s3076_s3 + $0x170] sm:$0xff]  }
  0xfd   :  { %2142 = vmatpush3.bf16.msra.mxu0 %v2352_v52  ;;  %v305_v25 = vpack.c.bf16 %v294_v14, %v294_v14  ;;  %v306_v26 = vpack.c.bf16 %v298_v15, %v298_v15  ;;  %v243_v30 = vpack.c.bf16 %v232_v20, %v232_v20  ;;  %v244_v31 = vpack.c.bf16 %v236_v21, %v236_v21  ;;  %v2374_v52 = vld [vmem:[%s3076_s3 + $0x148] sm:$0xff]   ;;  %v2395_v13 = vld [vmem:[%s3076_s3 + $0x1f0] sm:$0xff]   ;;  %v2398_v16 = vld [vmem:[%s3076_s3 + $0x178] sm:$0xff]  }
  0xfe   :  { %2164 = vmatpush3.bf16.msra.mxu1 %v2353_v53  ;;  %2143 = vmatprep.subr.bf16.mxu0 %v2354_v54  ;;  %v497_v36 = vunpack.c.l.b16 %v242_v29  ;;  %v496_v38 = vunpack.c.l.b16 %v241_v28  ;;  %v2393_v11 = vld [vmem:[%s3076_s3 + $0x1a8] sm:$0xff]   ;;  %v2396_v14 = vld [vmem:[%s3076_s3 + $0x130] sm:$0xff]   ;;  %v2400_v28 = vld [vmem:[%s3076_s3 + $0x138] sm:$0xff]  }
  0xff   :  { %2165 = vmatprep.subr.bf16.mxu1 %v2355_v55  ;;  %v346_v33 = vunpack.c.l.b16 %v306_v26  ;;  %v345_v35 = vunpack.c.l.b16 %v305_v25  ;;  %v499_v37 = vunpack.c.l.b16 %v244_v31  ;;  %v498_v39 = vunpack.c.l.b16 %v243_v30  ;;  %v2375_v55 = vld [vmem:[%s3076_s3 + $0x1c8] sm:$0xff]   ;;  %v2397_v15 = vld [vmem:[%s3076_s3 + $0x1b0] sm:$0xff]  }
 0x100   :  { %v2025_v17 = vld [vmem:[%s3078_s5 + $0x2] ss:$8 sm:$0x3]  ;;  %v2026_v18 = vld [vmem:[%s3078_s5 + $0x12] ss:$8 sm:$0x3] }
 0x101   :  { %2144 = vmatpush3.bf16.msra.mxu0 %v2356_v56  ;;  %v350_v40 = vrot.slane %v346_v33, 7  ;;  %v347_v41 = vrot.slane %v345_v35, 7  ;;  %v502_v42 = vrot.slane %v499_v37, 7  ;;  %v500_v43 = vrot.slane %v498_v39, 7  ;;  %v2376_v56 = vld [vmem:[%s3076_s3 + $0x108] sm:$0xff]   ;;  %v2401_v33 = vld [vmem:[%s3076_s3 + $0x1b8] sm:$0xff]  }
 0x102   :  { %2166 = vmatpush3.bf16.msra.mxu1 %v2357_v57  ;;  %2145 = vmatprep.subr.bf16.mxu0 %v2358_v58  ;;  %v2377_v57 = vld [vmem:[%s3076_s3 + $0x188] sm:$0xff]   ;;  %v2378_v58 = vld [vmem:[%s3076_s3 + $0x150] sm:$0xff]   ;;  %v653_v19 = vrot.slane %v2025_v17, %v2661_v5  ;;  %v657_v20 = vrot.slane %v2025_v17, %v2666_v7  ;;  %v661_v23 = vrot.slane %v2026_v18, %v2661_v5  ;;  %v2421_v17 = vld [vmem:[%s3076_s3 + $0x2a0] sm:$0xff]  }
 0x103   :  { %2167 = vmatprep.subr.bf16.mxu1 %v2359_v60  ;;  %v351_v45 = vsel %vm348_vm2, %v350_v40, %v344_v32  ;;  %v349_v46 = vsel %vm348_vm2, %v347_v41, %v343_v34  ;;  %v503_v49 = vsel %vm348_vm2, %v502_v42, %v497_v36  ;;  %v501_v51 = vsel %vm348_vm2, %v500_v43, %v496_v38  ;;  %v2380_v60 = vld [vmem:[%s3076_s3 + $0x110] sm:$0xff]   ;;  %v2043_v21 = vld [vmem:[%s3078_s5 + $0x3] ss:$8 sm:$0x3] }
 0x104   :  { %v353_v48 = vpack.c.b16 %v351_v45, %v351_v45  ;;  %v352_v50 = vpack.c.b16 %v349_v46, %v349_v46  ;;  %v505_v53 = vpack.c.b16 %v503_v49, %v503_v49  ;;  %v504_v54 = vpack.c.b16 %v501_v51, %v501_v51  ;;  %v2044_v25 = vld [vmem:[%s3078_s5 + $0x13] ss:$8 sm:$0x3]  ;;  %v2402_v40 = vld [vmem:[%s3076_s3 + $0x240] sm:$0xff]  }
 0x105   :  { %2146 = vmatpush3.bf16.msra.mxu0 %v2360_v61  ;;  %v2381_v61 = vld [vmem:[%s3076_s3 + $0x190] sm:$0xff]   ;;  %v665_v24 = vrot.slane %v2026_v18, %v2666_v7  ;;  %v868_v26 = vrot.slane %v2043_v21, %v2661_v5  ;;  %v670_v29 = vpack.c.bf16 %v653_v19, %v653_v19  ;;  %v671_v30 = vpack.c.bf16 %v657_v20, %v657_v20  ;;  %v2403_v45 = vld [vmem:[%s3076_s3 + $0x2c0] sm:$0xff]   ;;  %v2422_v18 = vld [vmem:[%s3076_s3 + $0x268] sm:$0xff]  }
 0x106   :  { %2168 = vmatpush3.bf16.msra.mxu1 %v2361_v62  ;;  %2147 = vmatprep.subr.bf16.mxu0 %v2362_v63  ;;  %v2382_v62 = vld [vmem:[%s3076_s3 + $0x158] sm:$0xff]   ;;  %v876_v31 = vrot.slane %v2044_v25, %v2661_v5  ;;  %v880_v32 = vrot.slane %v2044_v25, %v2666_v7  ;;  %v672_v34 = vpack.c.bf16 %v661_v23, %v661_v23  ;;  %v2423_v19 = vld [vmem:[%s3076_s3 + $0x2e8] sm:$0xff]   ;;  %v2427_v23 = vld [vmem:[%s3076_s3 + $0x2f0] sm:$0xff]  }
 0x107   :  { %2169 = vmatprep.subr.bf16.mxu1 %v2363_v1  ;;  %484 = vmatprep.mubr.bf16.mxu0 %v353_v48  ;;  %v2383_v63 = vld [vmem:[%s3076_s3 + $0x1d8] sm:$0xff]   ;;  %v673_v35 = vpack.c.bf16 %v665_v24, %v665_v24  ;;  %v885_v36 = vpack.c.bf16 %v868_v26, %v868_v26  ;;  %v711_v41 = vunpack.c.l.b16 %v671_v30  ;;  %v710_v43 = vunpack.c.l.b16 %v670_v29  ;;  %v2424_v20 = vld [vmem:[%s3076_s3 + $0x228] sm:$0xff]   ;;  %v2428_v24 = vld [vmem:[%s3076_s3 + $0x230] sm:$0xff]  }
 0x108   :  { %636 = vmatprep.mubr.bf16.mxu1 %v505_v53  ;;  %v2385_v1 = vld [vmem:[%s3076_s3 + $0x198] sm:$0xff]   ;;  %v887_v38 = vpack.c.bf16 %v876_v31, %v876_v31  ;;  %v888_v39 = vpack.c.bf16 %v880_v32, %v880_v32  ;;  %v2429_v25 = vld [vmem:[%s3076_s3 + $0x2b0] sm:$0xff]   ;;  %v2061_v26 = vld [vmem:[%s3078_s5 + $0x4] ss:$8 sm:$0x3] }
 0x109   :  { %2148 = vmatpush3.bf16.msra.mxu0 %v2364_v2  ;;  %v2386_v2 = vld [vmem:[%s3076_s3 + $0x160] sm:$0xff]   ;;  %v713_v42 = vunpack.c.l.b16 %v673_v35  ;;  %v925_v48 = vunpack.c.l.b16 %v885_v36  ;;  %v1087_v29 = vrot.slane %v2061_v26, %v2666_v7  ;;  %v2430_v31 = vld [vmem:[%s3076_s3 + $0x278] sm:$0xff]  }
 0x10a   :  { %2170 = vmatpush3.bf16.msra.mxu1 %v2365_v3  ;;  %2149 = vmatprep.subr.bf16.mxu0 %v2366_v4  ;;  %v2387_v3 = vld [vmem:[%s3076_s3 + $0x1e0] sm:$0xff]   ;;  %v927_v49 = vunpack.c.l.b16 %v887_v38  ;;  %v2431_v36 = vld [vmem:[%s3076_s3 + $0x2f8] sm:$0xff]  }
 0x10b   :  { %2171 = vmatprep.subr.bf16.mxu1 %v2367_v6  ;;  %v2388_v4 = vld [vmem:[%s3076_s3 + $0x120] sm:$0xff]   ;;  %v1101_v38 = vpack.c.bf16 %v1087_v29, %v1087_v29  ;;  %v2455_v29 = vld [vmem:[%s3076_s3 + $0x3e8] sm:$0xff]  }
 0x10c   :  { %v2389_v6 = vld [vmem:[%s3076_s3 + $0x1a0] sm:$0xff]   ;;  %v929_v53 = vrot.slane %v927_v49, 7 }
 0x10d   :  { %2150 = vmatpush3.bf16.msra.mxu0 %v2368_v8  ;;  %v2390_v8 = vld [vmem:[%s3076_s3 + $0x168] sm:$0xff]  }
 0x10e   :  { %2172 = vmatpush3.bf16.msra.mxu1 %v2369_v9  ;;  %2179 = vmatprep.subr.bf16.mxu0 %v2370_v22  ;;  %v2391_v9 = vld [vmem:[%s3076_s3 + $0x1e8] sm:$0xff]   ;;  %v2399_v22 = vld [vmem:[%s3076_s3 + $0x1f8] sm:$0xff]  }
 0x10f   :  { %2201 = vmatprep.subr.bf16.mxu1 %v2371_v27  ;;  %v872_v27 = vrot.slane %v2043_v21, %v2666_v7  ;;  %v2425_v21 = vld [vmem:[%s3076_s3 + $0x2a8] sm:$0xff]  }
 0x110   :  { %485 = vmatmul.mubr.bf16.vlgmr.msra.gmra.mrb[4].mxu0 %v352_v50  ;;  %v716_v50 = vrot.slane %v713_v42, 7  ;;  %v2079_v30 = vld [vmem:[%s3078_s5 + $0x5] ss:$8 sm:$0x3] }
 0x111   :  { %637 = vmatmul.mubr.bf16.vlgmr.msra.gmra.mrb[4].mxu1 %v504_v54  ;;  %2180 = vmatpush3.bf16.msra.mxu0 %v2372_v44  ;;  %v886_v37 = vpack.c.bf16 %v872_v27, %v872_v27  ;;  %v712_v44 = vunpack.c.l.b16 %v672_v34  ;;  %v2404_v54 = vld [vmem:[%s3076_s3 + $0x200] sm:$0xff]   ;;  %v2062_v27 = vld [vmem:[%s3078_s5 + $0x14] ss:$8 sm:$0x3]  ;;  %v1298_v35 = vrot.slane %v2079_v30, %v2661_v5 }
 0x112   :  { %2202 = vmatpush3.bf16.msra.mxu1 %v2373_v47  ;;  %2181 = vmatprep.subr.bf16.mxu0 %v2374_v52  ;;  %v928_v47 = vunpack.c.l.b16 %v888_v39  ;;  %v1091_v32 = vrot.slane %v2062_v27, %v2661_v5  ;;  %v2080_v34 = vld [vmem:[%s3078_s5 + $0x15] ss:$8 sm:$0x3]  ;;  %v1302_v39 = vrot.slane %v2079_v30, %v2666_v7  ;;  %v2456_v30 = vld [vmem:[%s3076_s3 + $0x328] sm:$0xff]  }
 0x113   :  { %2203 = vmatprep.subr.bf16.mxu1 %v2375_v55  ;;  %v926_v46 = vunpack.c.l.b16 %v886_v37  ;;  %v714_v51 = vrot.slane %v712_v44, 7  ;;  %v717_v55 = vsel %vm348_vm2, %v716_v50, %v711_v41  ;;  %v2432_v41 = vld [vmem:[%s3076_s3 + $0x238] sm:$0xff]   ;;  %v1310_v44 = vrot.slane %v2080_v34, %v2666_v7 }
 0x114   :  { %v931_v52 = vrot.slane %v928_v47, 7  ;;  %v1102_v42 = vpack.c.bf16 %v1091_v32, %v1091_v32  ;;  %v1141_v47 = vunpack.c.l.b16 %v1101_v38  ;;  %v2457_v32 = vld [vmem:[%s3076_s3 + $0x3a8] sm:$0xff]  }
 0x115   :  { %2182 = vmatpush3.bf16.msra.mxu0 %v2376_v56  ;;  %v715_v56 = vsel %vm348_vm2, %v714_v51, %v710_v43  ;;  %v1318_v51 = vpack.c.bf16 %v1310_v44, %v1310_v44 }
 0x116   :  { %2204 = vmatpush3.bf16.msra.mxu1 %v2377_v57  ;;  %2183 = vmatprep.subr.bf16.mxu0 %v2378_v58  ;;  %v2405_v57 = vld [vmem:[%s3076_s3 + $0x280] sm:$0xff]   ;;  %v719_v58 = vpack.c.b16 %v717_v55, %v717_v55 }
 0x117   :  { %2205 = vmatprep.subr.bf16.mxu1 %v2379_v59  ;;  %v932_v59 = vsel %vm348_vm2, %v931_v52, %v926_v46  ;;  %v2433_v46 = vld [vmem:[%s3076_s3 + $0x2b8] sm:$0xff]  }
 0x118   :  { %850 = vmatprep.mubr.bf16.mxu0 %v719_v58 }
 0x119   :  { %2184 = vmatpush3.bf16.msra.mxu0 %v2380_v60  ;;  %v718_v60 = vpack.c.b16 %v715_v56, %v715_v56 }
 0x11a   :  { %2206 = vmatpush3.bf16.msra.mxu1 %v2381_v61  ;;  %2185 = vmatprep.subr.bf16.mxu0 %v2382_v62  ;;  %v930_v61 = vsel %vm348_vm2, %v929_v53, %v925_v48  ;;  %v2406_v62 = vld [vmem:[%s3076_s3 + $0x248] sm:$0xff]   ;;  %v1316_v48 = vpack.c.bf16 %v1302_v39, %v1302_v39  ;;  %v1142_v53 = vunpack.c.l.b16 %v1102_v42 }
 0x11b   :  { %2207 = vmatprep.subr.bf16.mxu1 %v2383_v63  ;;  %v934_v63 = vpack.c.b16 %v932_v59, %v932_v59  ;;  %v2115_v39 = vld [vmem:[%s3078_s5 + $0x7] ss:$8 sm:$0x3] }
 0x11c   :  { %v1356_v59 = vunpack.c.l.b16 %v1316_v48  ;;  %v1728_v44 = vrot.slane %v2115_v39, %v2661_v5 }
 0x11d   :  { %2186 = vmatpush3.bf16.msra.mxu0 %v2384_v0  ;;  %v933_v0 = vpack.c.b16 %v930_v61, %v930_v61  ;;  %1065 = vmatprep.mubr.bf16.mxu1 %v934_v63  ;;  %v1144_v61 = vrot.slane %v1142_v53, 7 }
 0x11e   :  { %2208 = vmatpush3.bf16.msra.mxu1 %v2385_v1  ;;  %2187 = vmatprep.subr.bf16.mxu0 %v2386_v2  ;;  %v2407_v1 = vld [vmem:[%s3076_s3 + $0x2c8] sm:$0xff]  }
 0x11f   :  { %2209 = vmatprep.subr.bf16.mxu1 %v2387_v3  ;;  %v2408_v2 = vld [vmem:[%s3076_s3 + $0x208] sm:$0xff]  }
 0x120   :  { %v2409_v3 = vld [vmem:[%s3076_s3 + $0x288] sm:$0xff]  }
 0x121   :  { %2188 = vmatpush3.bf16.msra.mxu0 %v2388_v4  ;;  %v2410_v4 = vld [vmem:[%s3076_s3 + $0x250] sm:$0xff]  }
 0x122   :  { %2210 = vmatpush3.bf16.msra.mxu1 %v2389_v6  ;;  %2189 = vmatprep.subr.bf16.mxu0 %v2390_v8  ;;  %v2411_v6 = vld [vmem:[%s3076_s3 + $0x2d0] sm:$0xff]  }
 0x123   :  { %2211 = vmatprep.subr.bf16.mxu1 %v2391_v9  ;;  %v2412_v8 = vld [vmem:[%s3076_s3 + $0x210] sm:$0xff]  }
 0x124   :  { %v2413_v9 = vld [vmem:[%s3076_s3 + $0x290] sm:$0xff]  }
 0x125   :  { %2190 = vmatpush3.bf16.msra.mxu0 %v2392_v10  ;;  %v2414_v10 = vld [vmem:[%s3076_s3 + $0x258] sm:$0xff]  }
 0x126   :  { %2212 = vmatpush3.bf16.msra.mxu1 %v2393_v11  ;;  %2191 = vmatprep.subr.bf16.mxu0 %v2394_v12  ;;  %v2415_v11 = vld [vmem:[%s3076_s3 + $0x2d8] sm:$0xff]  }
 0x127   :  { %2213 = vmatprep.subr.bf16.mxu1 %v2395_v13  ;;  %v2416_v12 = vld [vmem:[%s3076_s3 + $0x218] sm:$0xff]  }
 0x128   :  { %v2417_v13 = vld [vmem:[%s3076_s3 + $0x298] sm:$0xff]  }
 0x129   :  { %2192 = vmatpush3.bf16.msra.mxu0 %v2396_v14  ;;  %v2418_v14 = vld [vmem:[%s3076_s3 + $0x260] sm:$0xff]  }
 0x12a   :  { %2214 = vmatpush3.bf16.msra.mxu1 %v2397_v15  ;;  %2193 = vmatprep.subr.bf16.mxu0 %v2398_v16  ;;  %v2419_v15 = vld [vmem:[%s3076_s3 + $0x2e0] sm:$0xff]  }
 0x12b   :  { %2215 = vmatprep.subr.bf16.mxu1 %v2399_v22  ;;  %v2420_v16 = vld [vmem:[%s3076_s3 + $0x220] sm:$0xff]   ;;  %v2426_v22 = vld [vmem:[%s3076_s3 + $0x270] sm:$0xff]  }
 0x12d   :  { %2194 = vmatpush3.bf16.msra.mxu0 %v2400_v28  ;;  %v1083_v28 = vrot.slane %v2061_v26, %v2661_v5  ;;  %v2452_v26 = vld [vmem:[%s3076_s3 + $0x320] sm:$0xff]  }
 0x12e   :  { %2216 = vmatpush3.bf16.msra.mxu1 %v2401_v33  ;;  %2223 = vmatprep.subr.bf16.mxu0 %v2402_v40  ;;  %v1095_v33 = vrot.slane %v2062_v27, %v2666_v7  ;;  %v1306_v40 = vrot.slane %v2080_v34, %v2661_v5  ;;  %v2454_v27 = vld [vmem:[%s3076_s3 + $0x368] sm:$0xff]   ;;  %v2460_v34 = vld [vmem:[%s3076_s3 + $0x330] sm:$0xff]  }
 0x12f   :  { %2245 = vmatprep.subr.bf16.mxu1 %v2403_v45  ;;  %v1100_v37 = vpack.c.bf16 %v1083_v28, %v1083_v28  ;;  %v1315_v45 = vpack.c.bf16 %v1298_v35, %v1298_v35  ;;  %v2453_v28 = vld [vmem:[%s3076_s3 + $0x3a0] sm:$0xff]  }
 0x130   :  { %851 = vmatmul.mubr.bf16.vlgmr.msra.gmra.mrb[8].mxu0 %v718_v60  ;;  %v1103_v43 = vpack.c.bf16 %v1095_v33, %v1095_v33  ;;  %v1317_v49 = vpack.c.bf16 %v1306_v40, %v1306_v40  ;;  %v1358_v60 = vunpack.c.l.b16 %v1318_v51  ;;  %v2459_v33 = vld [vmem:[%s3076_s3 + $0x3f0] sm:$0xff]   ;;  %v2097_v35 = vld [vmem:[%s3078_s5 + $0x6] ss:$8 sm:$0x3]  ;;  %v2462_v40 = vld [vmem:[%s3076_s3 + $0x378] sm:$0xff]  }
 0x131   :  { %1066 = vmatmul.mubr.bf16.vlgmr.msra.gmra.mrb[8].mxu1 %v933_v0  ;;  %2224 = vmatpush3.bf16.msra.mxu0 %v2404_v54  ;;  %v1140_v52 = vunpack.c.l.b16 %v1100_v37  ;;  %v2434_v54 = vld [vmem:[%s3076_s3 + $0x340] sm:$0xff]   ;;  %v1355_v55 = vunpack.c.l.b16 %v1315_v45  ;;  %v1513_v37 = vrot.slane %v2097_v35, %v2661_v5  ;;  %v1517_v38 = vrot.slane %v2097_v35, %v2666_v7  ;;  %v2463_v51 = vld [vmem:[%s3076_s3 + $0x3f8] sm:$0xff]  }
 0x132   :  { %2246 = vmatpush3.bf16.msra.mxu1 %v2405_v57  ;;  %2225 = vmatprep.subr.bf16.mxu0 %v2406_v62  ;;  %v1143_v50 = vunpack.c.l.b16 %v1103_v43  ;;  %v1357_v56 = vunpack.c.l.b16 %v1317_v49  ;;  %v2435_v57 = vld [vmem:[%s3076_s3 + $0x3c0] sm:$0xff]   ;;  %v1361_v0 = vrot.slane %v1358_v60, 7  ;;  %v2116_v43 = vld [vmem:[%s3078_s5 + $0x17] ss:$8 sm:$0x3]  ;;  %v1732_v45 = vrot.slane %v2115_v39, %v2666_v7 }
 0x133   :  { %2247 = vmatprep.subr.bf16.mxu1 %v2407_v1  ;;  %v1145_v1 = vsel %vm348_vm2, %v1144_v61, %v1140_v52  ;;  %v1531_v48 = vpack.c.bf16 %v1517_v38, %v1517_v38  ;;  %v1736_v49 = vrot.slane %v2116_v43, %v2661_v5  ;;  %v2465_v61 = vld [vmem:[%s3076_s3 + $0x3b8] sm:$0xff]  }
 0x134   :  { %v1146_v58 = vrot.slane %v1143_v50, 7  ;;  %v1359_v62 = vrot.slane %v1357_v56, 7  ;;  %v1740_v50 = vrot.slane %v2116_v43, %v2666_v7  ;;  %v2464_v56 = vld [vmem:[%s3076_s3 + $0x338] sm:$0xff]  }
 0x135   :  { %2226 = vmatpush3.bf16.msra.mxu0 %v2408_v2 }
 0x136   :  { %2248 = vmatpush3.bf16.msra.mxu1 %v2409_v3  ;;  %2227 = vmatprep.subr.bf16.mxu0 %v2410_v4  ;;  %v1147_v63 = vsel %vm348_vm2, %v1146_v58, %v1141_v47  ;;  %v1148_v3 = vpack.c.b16 %v1145_v1, %v1145_v1  ;;  %v1360_v4 = vsel %vm348_vm2, %v1359_v62, %v1355_v55 }
 0x137   :  { %2249 = vmatprep.subr.bf16.mxu1 %v2411_v6  ;;  %v1149_v2 = vpack.c.b16 %v1147_v63, %v1147_v63  ;;  %v2436_v6 = vld [vmem:[%s3076_s3 + $0x300] sm:$0xff]   ;;  %v1530_v47 = vpack.c.bf16 %v1513_v37, %v1513_v37  ;;  %v1746_v55 = vpack.c.bf16 %v1732_v45, %v1732_v45  ;;  %v1748_v58 = vpack.c.bf16 %v1740_v50, %v1740_v50 }
 0x139   :  { %2228 = vmatpush3.bf16.msra.mxu0 %v2412_v8  ;;  %v1362_v8 = vsel %vm348_vm2, %v1361_v0, %v1356_v59  ;;  %1280 = vmatprep.mubr.bf16.mxu0 %v1149_v2  ;;  %v1786_v62 = vunpack.c.l.b16 %v1746_v55  ;;  %v1788_v63 = vunpack.c.l.b16 %v1748_v58 }
 0x13a   :  { %2250 = vmatpush3.bf16.msra.mxu1 %v2413_v9  ;;  %2229 = vmatprep.subr.bf16.mxu0 %v2414_v10  ;;  %v1363_v9 = vpack.c.b16 %v1360_v4, %v1360_v4  ;;  %v2438_v10 = vld [vmem:[%s3076_s3 + $0x348] sm:$0xff]  }
 0x13b   :  { %2251 = vmatprep.subr.bf16.mxu1 %v2415_v11  ;;  %v1364_v11 = vpack.c.b16 %v1362_v8, %v1362_v8  ;;  %v1791_v4 = vrot.slane %v1788_v63, 7 }
 0x13d   :  { %2230 = vmatpush3.bf16.msra.mxu0 %v2416_v12  ;;  %v2437_v12 = vld [vmem:[%s3076_s3 + $0x380] sm:$0xff]   ;;  %1495 = vmatprep.mubr.bf16.mxu1 %v1364_v11  ;;  %v1792_v11 = vsel %vm348_vm2, %v1791_v4, %v1786_v62 }
 0x13e   :  { %2252 = vmatpush3.bf16.msra.mxu1 %v2417_v13  ;;  %2231 = vmatprep.subr.bf16.mxu0 %v2418_v14  ;;  %v2439_v13 = vld [vmem:[%s3076_s3 + $0x3c8] sm:$0xff]  }
 0x13f   :  { %2253 = vmatprep.subr.bf16.mxu1 %v2419_v15  ;;  %v2440_v14 = vld [vmem:[%s3076_s3 + $0x308] sm:$0xff]   ;;  %v2442_v15 = vld [vmem:[%s3076_s3 + $0x350] sm:$0xff]  }
 0x141   :  { %2232 = vmatpush3.bf16.msra.mxu0 %v2420_v16  ;;  %v2441_v16 = vld [vmem:[%s3076_s3 + $0x388] sm:$0xff]  }
 0x142   :  { %2254 = vmatpush3.bf16.msra.mxu1 %v2421_v17  ;;  %2233 = vmatprep.subr.bf16.mxu0 %v2422_v18  ;;  %v2443_v17 = vld [vmem:[%s3076_s3 + $0x3d0] sm:$0xff]  }
 0x143   :  { %2255 = vmatprep.subr.bf16.mxu1 %v2423_v19  ;;  %v2444_v18 = vld [vmem:[%s3076_s3 + $0x310] sm:$0xff]   ;;  %v2446_v19 = vld [vmem:[%s3076_s3 + $0x358] sm:$0xff]  }
 0x145   :  { %2234 = vmatpush3.bf16.msra.mxu0 %v2424_v20  ;;  %v2445_v20 = vld [vmem:[%s3076_s3 + $0x390] sm:$0xff]  }
 0x146   :  { %2256 = vmatpush3.bf16.msra.mxu1 %v2425_v21  ;;  %2235 = vmatprep.subr.bf16.mxu0 %v2426_v22  ;;  %v2447_v21 = vld [vmem:[%s3076_s3 + $0x3d8] sm:$0xff]  }
 0x147   :  { %2257 = vmatprep.subr.bf16.mxu1 %v2427_v23  ;;  %v2448_v22 = vld [vmem:[%s3076_s3 + $0x318] sm:$0xff]   ;;  %v2450_v23 = vld [vmem:[%s3076_s3 + $0x360] sm:$0xff]  }
 0x149   :  { %2236 = vmatpush3.bf16.msra.mxu0 %v2428_v24  ;;  %v2449_v24 = vld [vmem:[%s3076_s3 + $0x398] sm:$0xff]  }
 0x14a   :  { %2258 = vmatpush3.bf16.msra.mxu1 %v2429_v25  ;;  %2237 = vmatprep.subr.bf16.mxu0 %v2430_v31  ;;  %v2451_v25 = vld [vmem:[%s3076_s3 + $0x3e0] sm:$0xff]   ;;  %v2458_v31 = vld [vmem:[%s3076_s3 + $0x370] sm:$0xff]  }
 0x14b   :  { %2259 = vmatprep.subr.bf16.mxu1 %v2431_v36  ;;  %v2098_v36 = vld [vmem:[%s3078_s5 + $0x16] ss:$8 sm:$0x3] }
 0x14c   :  { %v1525_v42 = vrot.slane %v2098_v36, %v2666_v7  ;;  %v1570_v7 = vunpack.c.l.b16 %v1530_v47 }
 0x14d   :  { %2238 = vmatpush3.bf16.msra.mxu0 %v2432_v41  ;;  %v1521_v41 = vrot.slane %v2098_v36, %v2661_v5  ;;  %v1571_v5 = vunpack.c.l.b16 %v1531_v48 }
 0x14e   :  { %2260 = vmatpush3.bf16.msra.mxu1 %v2433_v46  ;;  %2267 = vmatprep.subr.bf16.mxu0 %v2434_v54  ;;  %v2461_v46 = vld [vmem:[%s3076_s3 + $0x3b0] sm:$0xff]   ;;  %v1533_v53 = vpack.c.bf16 %v1525_v42, %v1525_v42  ;;  %v1745_v54 = vpack.c.bf16 %v1728_v44, %v1728_v44 }
 0x14f   :  { %2289 = vmatprep.subr.bf16.mxu1 %v2435_v57  ;;  %v1532_v52 = vpack.c.bf16 %v1521_v41, %v1521_v41  ;;  %v1747_v57 = vpack.c.bf16 %v1736_v49, %v1736_v49 }
 0x150   :  { %1281 = vmatmul.mubr.bf16.vlgmr.msra.gmra.mrb[12].mxu0 %v1148_v3  ;;  %v1573_v59 = vunpack.c.l.b16 %v1533_v53  ;;  %v1785_v0 = vunpack.c.l.b16 %v1745_v54 }
 0x151   :  { %2268 = vmatpush3.bf16.msra.mxu0 %v2436_v6  ;;  %1496 = vmatmul.mubr.bf16.vlgmr.msra.gmra.mrb[12].mxu1 %v1363_v9  ;;  %v1572_v60 = vunpack.c.l.b16 %v1532_v52  ;;  %v1787_v1 = vunpack.c.l.b16 %v1747_v57 }
 0x152   :  { %2269 = vmatprep.subr.bf16.mxu0 %v2438_v10  ;;  %2290 = vmatpush3.bf16.msra.mxu1 %v2437_v12  ;;  %v1576_v2 = vrot.slane %v1573_v59, 7 }
 0x153   :  { %2291 = vmatprep.subr.bf16.mxu1 %v2439_v13  ;;  %v1574_v3 = vrot.slane %v1572_v60, 7  ;;  %v1789_v6 = vrot.slane %v1787_v1, 7  ;;  %v2133_v60 = vld [vmem:[%s3077_s4] ss:$0 sm:$0xff] }
 0x154   :  { %v1577_v8 = vsel %vm348_vm2, %v1576_v2, %v1571_v5 }
 0x155   :  { %2270 = vmatpush3.bf16.msra.mxu0 %v2440_v14  ;;  %v1575_v9 = vsel %vm348_vm2, %v1574_v3, %v1570_v7  ;;  %v1579_v10 = vpack.c.b16 %v1577_v8, %v1577_v8  ;;  %v1790_v13 = vsel %vm348_vm2, %v1789_v6, %v1785_v0  ;;  %v1794_v14 = vpack.c.b16 %v1792_v11, %v1792_v11 }
 0x156   :  { %2271 = vmatprep.subr.bf16.mxu0 %v2442_v15  ;;  %2292 = vmatpush3.bf16.msra.mxu1 %v2441_v16  ;;  %v1578_v12 = vpack.c.b16 %v1575_v9, %v1575_v9  ;;  %v1793_v15 = vpack.c.b16 %v1790_v13, %v1790_v13 }
 0x157   :  { %2293 = vmatprep.subr.bf16.mxu1 %v2443_v17  ;;  %1710 = vmatprep.mubr.bf16.mxu0 %v1579_v10 }
 0x158   :  { %1925 = vmatprep.mubr.bf16.mxu1 %v1794_v14 }
 0x159   :  { %2272 = vmatpush3.bf16.msra.mxu0 %v2444_v18 }
 0x15a   :  { %2273 = vmatprep.subr.bf16.mxu0 %v2446_v19  ;;  %2294 = vmatpush3.bf16.msra.mxu1 %v2445_v20 }
 0x15b   :  { %2295 = vmatprep.subr.bf16.mxu1 %v2447_v21 }
 0x15d   :  { %2274 = vmatpush3.bf16.msra.mxu0 %v2448_v22 }
 0x15e   :  { %2275 = vmatprep.subr.bf16.mxu0 %v2450_v23  ;;  %2296 = vmatpush3.bf16.msra.mxu1 %v2449_v24 }
 0x15f   :  { %2297 = vmatprep.subr.bf16.mxu1 %v2451_v25 }
 0x161   :  { %2276 = vmatpush3.bf16.msra.mxu0 %v2452_v26 }
 0x162   :  { %2277 = vmatprep.subr.bf16.mxu0 %v2454_v27  ;;  %2298 = vmatpush3.bf16.msra.mxu1 %v2453_v28 }
 0x163   :  { %2299 = vmatprep.subr.bf16.mxu1 %v2455_v29 }
 0x165   :  { %2278 = vmatpush3.bf16.msra.mxu0 %v2456_v30 }
 0x166   :  { %2279 = vmatprep.subr.bf16.mxu0 %v2458_v31  ;;  %2300 = vmatpush3.bf16.msra.mxu1 %v2457_v32 }
 0x167   :  { %2301 = vmatprep.subr.bf16.mxu1 %v2459_v33 }
 0x169   :  { %2280 = vmatpush3.bf16.msra.mxu0 %v2460_v34 }
 0x16a   :  { %2281 = vmatprep.subr.bf16.mxu0 %v2462_v40  ;;  %2302 = vmatpush3.bf16.msra.mxu1 %v2461_v46 }
 0x16b   :  { %2303 = vmatprep.subr.bf16.mxu1 %v2463_v51 }
 0x16d   :  { %2282 = vmatpush3.bf16.msra.mxu0 %v2464_v56 }
 0x16e   :  { %2304 = vmatpush3.bf16.msra.mxu1 %v2465_v61 }
 0x170   :  { %1711 = vmatmul.mubr.bf16.vlgmr.msra.gmra.mrb[16].mxu0 %v1578_v12 }
 0x171   :  { %1926 = vmatmul.mubr.bf16.vlgmr.msra.gmra.mrb[16].mxu1 %v1793_v15 }
 0x1e3   :  { %v2151_v16 = vpop.f32.mrb[4].mxu0 }
 0x1e4   :  { %v2173_v17 = vpop.f32.mrb[4].mxu1  ;;  %v2152_v18 = vpop.f32.mrb[5].mxu0 }
 0x1e5   :  { %v2153_v19 = vadd.f32 %v2152_v18, %v2151_v16  ;;  %v2174_v20 = vpop.f32.mrb[5].mxu1  ;;  %v2154_v21 = vpop.f32.mrb[6].mxu0 }
 0x1e6   :  { %v2175_v22 = vadd.f32 %v2174_v20, %v2173_v17  ;;  %v2176_v23 = vpop.f32.mrb[6].mxu1  ;;  %v2155_v24 = vpop.f32.mrb[7].mxu0 }
 0x1e7   :  { %v2177_v25 = vpop.f32.mrb[7].mxu1 }
 0x1e8   :  { %v639_v26 = vadd.f32 %v2175_v22, %v2153_v19 }
 0x203   :  { %v2195_v27 = vpop.f32.mrb[8].mxu0 }
 0x204   :  { %v2217_v28 = vpop.f32.mrb[8].mxu1  ;;  %v2196_v29 = vpop.f32.mrb[9].mxu0 }
 0x205   :  { %v2197_v30 = vadd.f32 %v2196_v29, %v2195_v27  ;;  %v2218_v31 = vpop.f32.mrb[9].mxu1  ;;  %v2198_v32 = vpop.f32.mrb[10].mxu0 }
 0x206   :  { %v2219_v33 = vadd.f32 %v2218_v31, %v2217_v28  ;;  %v2220_v34 = vpop.f32.mrb[10].mxu1  ;;  %v2199_v35 = vpop.f32.mrb[11].mxu0 }
 0x207   :  { %v858_v36 = vadd.f32 %v2197_v30, %v639_v26  ;;  %v2221_v37 = vpop.f32.mrb[11].mxu1 }
 0x209   :  { %v1073_v38 = vadd.f32 %v2219_v33, %v858_v36 }
 0x223   :  { %v2239_v39 = vpop.f32.mrb[12].mxu0 }
 0x224   :  { %v2240_v40 = vpop.f32.mrb[13].mxu0  ;;  %v2261_v41 = vpop.f32.mrb[12].mxu1 }
 0x225   :  { %v2241_v42 = vadd.f32 %v2240_v40, %v2239_v39  ;;  %v2242_v43 = vpop.f32.mrb[14].mxu0  ;;  %v2262_v44 = vpop.f32.mrb[13].mxu1 }
 0x226   :  { %v2243_v45 = vpop.f32.mrb[15].mxu0  ;;  %v2263_v47 = vadd.f32 %v2262_v44, %v2261_v41  ;;  %v2264_v48 = vpop.f32.mrb[14].mxu1 }
 0x227   :  { %v1288_v46 = vadd.f32 %v2241_v42, %v1073_v38  ;;  %v2265_v49 = vpop.f32.mrb[15].mxu1 }
 0x229   :  { %v1503_v50 = vadd.f32 %v2263_v47, %v1288_v46 }
 0x243   :  { %v2283_v51 = vpop.f32.mrb[16].mxu0 }
 0x244   :  { %v2305_v52 = vpop.f32.mrb[16].mxu1  ;;  %v2284_v53 = vpop.f32.mrb[17].mxu0 }
 0x245   :  { %v2285_v54 = vadd.f32 %v2284_v53, %v2283_v51  ;;  %v2306_v55 = vpop.f32.mrb[17].mxu1  ;;  %v2286_v56 = vpop.f32.mrb[18].mxu0 }
 0x246   :  { %v2307_v57 = vadd.f32 %v2306_v55, %v2305_v52  ;;  %v2308_v58 = vpop.f32.mrb[18].mxu1  ;;  %v2287_v5 = vpop.f32.mrb[19].mxu0 }
 0x247   :  { %v1718_v59 = vadd.f32 %v2285_v54, %v1503_v50  ;;  %v2309_v7 = vpop.f32.mrb[19].mxu1 }
 0x249   :  { %v1933_v61 = vadd.f32 %v2307_v57, %v1718_v59 }
 0x24b   :  { %v1941_v62 = vadd.f32 %v2133_v60, %v1933_v61 }
 0x24d   :  { %1942 = vst [vmem:[#allocation3] sm:$0x3] %v1941_v62 }
 0x24e   :  { %2477 = shalt.err (!%p2474_p5)
}
 0x24f   :  { %s2478_s23 = scalar_lea.hbm %s3079_s6, 32 }
 0x250   :  { %p2479_p6 = scmp.ne.s32.totalorder %s3079_s6, %s2478_s23  ;;  %p2482_p7 = scmp.lt.u32.totalorder %s2478_s23, %s3079_s6 }
 0x252   :  { %p2484_p8 = pnand %p2482_p7, %p2479_p6 }
 0x254   :  { %2487 = shalt.err (!%p2484_p8)
}
 0x255   :  { %1954 = dma.vmem_to_hbm [thread:$0]  %s1952_s1, 32, %s3079_s6, [#allocation4]  }
 0x256   :  { %2492 = dma.done.wait [#allocation4], 32  }
 0x257   :  { %2493 = vsyncadd [#allocation4], 4294967264 }
 0x258   :  { %1960 = vsyncpa [#allocation4], 1 }

</bundles_post_ra>
